<compile_context>
chip_gen: v7x
topology: tpu7x:2x2x1
jax: 0.10.0
libtpu: 0.0.40
codegen_flags: <defaults>
</compile_context>

<pallas_src>
import math

import jax
import jax.numpy as jnp
from jax import lax
from jax.experimental import pallas as pl
from jax.experimental.pallas import tpu as pltpu

_LANE = 128
_SUBLANE = 8
_VMEM_LIMIT_BYTES = 48 * 1024 * 1024    # below v7x's 64 MiB physical VMEM
_VMEM_TILE_BUDGET = 24 * 1024 * 1024    # row-tile working-set budget (headroom kept)


def _round_up(x, m):
    return (x + m - 1) // m * m


def _domain_classifier_kernel(x_ref, w1_ref, b1_ref, w2_ref, b2_ref, out_ref):
    # fc1: h = x @ W1^T + b1.
    #   x is cast f32->bf16 in-kernel (rides a free VPU slot); the matmul
    #   contracts dim 1 of both operands so the PyTorch [out, in] weight layout
    #   is used as-is (no transpose); MXU with f32 accumulation.
    x = x_ref[...].astype(w1_ref.dtype)
    h = lax.dot_general(
        x, w1_ref[...],
        dimension_numbers=(((1,), (1,)), ((), ())),
        preferred_element_type=jnp.float32,
    )
    h = h + b1_ref[...]                                   # (tile_n, Hp), f32

    # fc2 has a single output unit -> VPU multiply + lane reduce in exact f32
    # instead of an MXU matmul with 127 dead output columns.  Padded columns
    # of W1 rows / b1 / w2 are zero, so they contribute nothing.
    logits = jnp.sum(h * w2_ref[...], axis=-1, keepdims=True) + b2_ref[...]

    # sigmoid: exp and the (approx) reciprocal both go to the EUP slot.
    out_ref[...] = pl.reciprocal(1.0 + jnp.exp(-logits), approx=True).astype(
        out_ref.dtype)


def prepare_domain_classifier_params(params, *, compute_dtype=jnp.bfloat16):
    """One-time padding / casting of the parameters (hoisted out of forward)."""
    w1, b1 = params["fc1_w"], params["fc1_b"]    # [H, D], [H]
    w2, b2 = params["fc2_w"], params["fc2_b"]    # [1, H], [1]
    H, D = w1.shape
    Hp = _round_up(H, _LANE)                     # lane-dense hidden dim

    w1p = jnp.zeros((Hp, D), compute_dtype).at[:H, :].set(w1.astype(compute_dtype))
    b1p = jnp.zeros((1, Hp), jnp.float32).at[0, :H].set(b1.astype(jnp.float32))
    w2p = jnp.zeros((1, Hp), jnp.float32).at[0, :H].set(w2[0].astype(jnp.float32))
    b2p = b2.astype(jnp.float32).reshape(1, 1)
    return {"w1": w1p, "b1": b1p, "w2": w2p, "b2": b2p}


def domain_classifier_forward(x, prepared, *, tile_n=4096):
    """Runs DomainClassifier.forward. Returns sigmoid(fc2(fc1(x))), shape [N, 1] f32."""
    w1p, b1p, w2p, b2p = prepared["w1"], prepared["b1"], prepared["w2"], prepared["b2"]
    N, D = x.shape
    Hp = w1p.shape[0]
    assert w1p.shape[1] == D, (w1p.shape, D)

    # --- row-tile selection --------------------------------------------------
    # Big tiles amortize the per-step grid overhead; clamp to the array, to a
    # VMEM working-set budget (matters for large H on v7x), and keep >= 2 grid
    # steps so the "parallel" axis can be sharded across both v7x TensorCores
    # (harmless on single-TC v5e/v6e).
    per_row_bytes = 2 * D * 4 + Hp * 4 + 2 * 4   # dbl-buffered x + h + dbl-buffered out
    weight_bytes = w1p.size * 2 + (b1p.size + w2p.size + b2p.size) * 4
    vmem_rows = max(_SUBLANE,
                    (_VMEM_TILE_BUDGET - weight_bytes) // per_row_bytes)
    tile_n = max(_SUBLANE, min(_round_up(tile_n, _SUBLANE),
                               _round_up(N, _SUBLANE),
                               vmem_rows // _SUBLANE * _SUBLANE))
    if N > _SUBLANE and pl.cdiv(N, tile_n) < 2:
        tile_n = _round_up(pl.cdiv(N, 2), _SUBLANE)
    grid_n = pl.cdiv(N, tile_n)

    # TODO(synk): for very large production H/D, add pipeline_mode=pl.Buffered(1)
    # on the constant-index weight specs to drop their second VMEM buffer.
    return pl.pallas_call(
        _domain_classifier_kernel,
        out_shape=jax.ShapeDtypeStruct((N, 1), jnp.float32),
        grid=(grid_n,),
        in_specs=[
            pl.BlockSpec((tile_n, D), lambda i: (i, 0)),   # x: row-tiled, unpadded
            pl.BlockSpec((Hp, D), lambda i: (0, 0)),       # W1 (bf16): resident
            pl.BlockSpec((1, Hp), lambda i: (0, 0)),       # b1 (f32):  resident
            pl.BlockSpec((1, Hp), lambda i: (0, 0)),       # w2 row (f32): resident
            pl.BlockSpec((1, 1), lambda i: (0, 0)),        # b2 (f32):  resident
        ],
        out_specs=pl.BlockSpec((tile_n, 1), lambda i: (i, 0)),
        compiler_params=pltpu.CompilerParams(
            dimension_semantics=("parallel",),             # megacore on v7x
            vmem_limit_bytes=_VMEM_LIMIT_BYTES,
        ),
    )(x, w1p, b1p, w2p, b2p)


def _linear_init(key, out_features, in_features):
    # Matches torch nn.Linear defaults:
    #   weight: kaiming_uniform_(a=sqrt(5)) == U(-1/sqrt(fan_in), 1/sqrt(fan_in))
    #   bias  : U(-1/sqrt(fan_in), 1/sqrt(fan_in))
    kw, kb = jax.random.split(key)
    bound = 1.0 / math.sqrt(in_features)
    w = jax.random.uniform(kw, (out_features, in_features), dtype=jnp.float32,
                           minval=-bound, maxval=bound)
    b = jax.random.uniform(kb, (out_features,), dtype=jnp.float32,
                           minval=-bound, maxval=bound)
    return w, b


def init_domain_classifier_params(key, input_dim, hidden_dim):
    k1, k2 = jax.random.split(key)
    w1, b1 = _linear_init(k1, hidden_dim, input_dim)
    w2, b2 = _linear_init(k2, 1, hidden_dim)
    return {"fc1_w": w1, "fc1_b": b1, "fc2_w": w2, "fc2_b": b2}


if __name__ == "__main__":
    # Small shapes consistent with the module: batch=16, input_dim=32, hidden_dim=64.
    N, input_dim, hidden_dim = 16, 32, 64

    key = jax.random.PRNGKey(0)
    k_x, k_params = jax.random.split(key)

    x = jax.random.normal(k_x, (N, input_dim), dtype=jnp.float32)
    params = init_domain_classifier_params(k_params, input_dim, hidden_dim)

    prepared = prepare_domain_classifier_params(params)   # one-time pad/cast
    out = domain_classifier_forward(x, prepared)
    jax.block_until_ready(out)
    assert out.shape == (N, 1), out.shape

    # Pure-JAX f32 reference (fc1 runs in bf16 with f32 accumulation and the
    # sigmoid uses an approx reciprocal, so allow a modest tolerance).
    logits_ref = (x @ params["fc1_w"].T + params["fc1_b"]) @ params["fc2_w"].T + params["fc2_b"]
    out_ref = jax.nn.sigmoid(logits_ref)
    assert jnp.allclose(out, out_ref, atol=2e-2, rtol=2e-2), (
        float(jnp.max(jnp.abs(out - out_ref))))

    print("KERNEL_OK")
</pallas_src>

<mosaic_0001>
module attributes {stable_mosaic.version = 11 : i64} {
  func.func @_domain_classifier_kernel(%arg0: i32, %arg1: memref<8x32xf32, #tpu.memory_space<vmem>>, %arg2: memref<128x32xbf16, #tpu.memory_space<vmem>>, %arg3: memref<1x128xf32, #tpu.memory_space<vmem>>, %arg4: memref<1x128xf32, #tpu.memory_space<vmem>>, %arg5: memref<1x1xf32, #tpu.memory_space<vmem>>, %arg6: memref<8x1xf32, #tpu.memory_space<vmem>>) attributes {dimension_semantics = [#tpu.dimension_semantics<parallel>], iteration_bounds = array<i64: 2>, scalar_prefetch = 0 : i64, scratch_operands = 0 : i64, tpu.core_type = #tpu.core_type<tc>, window_params = [{transform_indices = @transform_0, window_bounds = array<i64: 8, 32>}, {pipeline_mode = #tpu.pipeline_mode<synchronous>, transform_indices = @transform_1, window_bounds = array<i64: 128, 32>}, {pipeline_mode = #tpu.pipeline_mode<synchronous>, transform_indices = @transform_2, window_bounds = array<i64: 1, 128>}, {pipeline_mode = #tpu.pipeline_mode<synchronous>, transform_indices = @transform_3, window_bounds = array<i64: 1, 128>}, {pipeline_mode = #tpu.pipeline_mode<synchronous>, transform_indices = @transform_4, window_bounds = array<i64: 1, 1>}, {transform_indices = @transform_5, window_bounds = array<i64: 8, 1>}]} {
    %c0 = arith.constant 0 : index
    %c0_0 = arith.constant 0 : index
    %0 = vector.load %arg1[%c0, %c0_0] : memref<8x32xf32, #tpu.memory_space<vmem>>, vector<8x32xf32>
    %1 = arith.truncf %0 : vector<8x32xf32> to vector<8x32xbf16>
    %c0_1 = arith.constant 0 : index
    %c0_2 = arith.constant 0 : index
    %2 = vector.load %arg2[%c0_1, %c0_2] : memref<128x32xbf16, #tpu.memory_space<vmem>>, vector<128x32xbf16>
    %cst = arith.constant dense<0.000000e+00> : vector<8x128xf32>
    %3 = tpu.matmul %1, %2, %cst {dimension_numbers = #tpu.dot_dimension_numbers<[1], [1], [0], [0], [0, 0, 1, 0], [], []>} : vector<8x32xbf16>, vector<128x32xbf16>, vector<8x128xf32> -> vector<8x128xf32>
    %c0_3 = arith.constant 0 : index
    %c0_4 = arith.constant 0 : index
    %4 = vector.load %arg3[%c0_3, %c0_4] : memref<1x128xf32, #tpu.memory_space<vmem>>, vector<1x128xf32>
    %5 = vector.broadcast %4 : vector<1x128xf32> to vector<8x128xf32>
    %6 = arith.addf %3, %5 : vector<8x128xf32>
    %c0_5 = arith.constant 0 : index
    %c0_6 = arith.constant 0 : index
    %7 = vector.load %arg4[%c0_5, %c0_6] : memref<1x128xf32, #tpu.memory_space<vmem>>, vector<1x128xf32>
    %8 = vector.broadcast %7 : vector<1x128xf32> to vector<8x128xf32>
    %9 = arith.mulf %6, %8 : vector<8x128xf32>
    %cst_7 = arith.constant dense<0.000000e+00> : vector<8xf32>
    %10 = vector.multi_reduction <add>, %9, %cst_7 [1] : vector<8x128xf32> to vector<8xf32>
    %11 = vector.shape_cast %10 : vector<8xf32> to vector<8x1xf32>
    %c0_8 = arith.constant 0 : index
    %c0_9 = arith.constant 0 : index
    %12 = vector.load %arg5[%c0_8, %c0_9] : memref<1x1xf32, #tpu.memory_space<vmem>>, vector<1x1xf32>
    %13 = vector.broadcast %12 : vector<1x1xf32> to vector<8x1xf32>
    %14 = arith.addf %11, %13 : vector<8x1xf32>
    %cst_10 = arith.constant 0.000000e+00 : f32
    %15 = vector.broadcast %cst_10 : f32 to vector<8x1xf32>
    %16 = arith.subf %15, %14 : vector<8x1xf32>
    %17 = math.exp %16 : vector<8x1xf32>
    %cst_11 = arith.constant 1.000000e+00 : f32
    %18 = vector.broadcast %cst_11 : f32 to vector<8x1xf32>
    %19 = arith.addf %18, %17 : vector<8x1xf32>
    %20 = tpu.reciprocal %19 {approx = true} : vector<8x1xf32> -> vector<8x1xf32>
    %c0_12 = arith.constant 0 : index
    %c0_13 = arith.constant 0 : index
    %21 = vector.load %arg6[%c0_12, %c0_13] : memref<8x1xf32, #tpu.memory_space<vmem>>, vector<8x1xf32>
    tpu.vector_store %arg6[%c0_12, %c0_13], %20 {strides = array<i32>} : memref<8x1xf32, #tpu.memory_space<vmem>>, vector<8x1xf32>,
    return
  }
  func.func @transform_0(%arg0: i32) -> (i32, i32) {
    %c0_i32 = arith.constant 0 : i32
    %c0_i32_0 = arith.constant 0 : i32
    return %arg0, %c0_i32 : i32, i32
  }
  func.func @transform_1(%arg0: i32) -> (i32, i32) {
    %c0_i32 = arith.constant 0 : i32
    %c0_i32_0 = arith.constant 0 : i32
    %c0_i32_1 = arith.constant 0 : i32
    return %c0_i32, %c0_i32_0 : i32, i32
  }
  func.func @transform_2(%arg0: i32) -> (i32, i32) {
    %c0_i32 = arith.constant 0 : i32
    %c0_i32_0 = arith.constant 0 : i32
    %c0_i32_1 = arith.constant 0 : i32
    return %c0_i32, %c0_i32_0 : i32, i32
  }
  func.func @transform_3(%arg0: i32) -> (i32, i32) {
    %c0_i32 = arith.constant 0 : i32
    %c0_i32_0 = arith.constant 0 : i32
    %c0_i32_1 = arith.constant 0 : i32
    return %c0_i32, %c0_i32_0 : i32, i32
  }
  func.func @transform_4(%arg0: i32) -> (i32, i32) {
    %c0_i32 = arith.constant 0 : i32
    %c0_i32_0 = arith.constant 0 : i32
    %c0_i32_1 = arith.constant 0 : i32
    return %c0_i32, %c0_i32_0 : i32, i32
  }
  func.func @transform_5(%arg0: i32) -> (i32, i32) {
    %c0_i32 = arith.constant 0 : i32
    %c0_i32_0 = arith.constant 0 : i32
    return %arg0, %c0_i32 : i32, i32
  }
}

</mosaic_0001>

<bundles_post_ra>
// kernel: tpu_custom_call.1
= control target key start
LH: loop header
LB: loop body
LE: loop exit
PB: predicated region body
PF: predicated region fallthrough
CT: control target
= control target key end

     0   :  { %s549_s20 = smov 0   ;;  %s612_s0 = inlined_call_operand.vmem [shape: f32[16,32], index: 0, kind: input, shape index: {}]   ;;  %s613_s1 = inlined_call_operand.vmem [shape: bf16[128,32], index: 1, kind: input, shape index: {}]   ;;  %s614_s2 = inlined_call_operand.vmem [shape: f32[1,128], index: 2, kind: input, shape index: {}]   ;;  %s615_s3 = inlined_call_operand.vmem [shape: f32[1,128], index: 3, kind: input, shape index: {}]   ;;  %s616_s4 = inlined_call_operand.<no memory space> [shape: f32[1,1], index: 4, kind: input, shape index: {}]   ;;  %s617_s5 = inlined_call_operand.vmem [shape: f32[16,1], index: 5, kind: output, shape index: {}]  }
   0x1   :  { %v10_v0 = vstv %s616_s4 }
   0x2   :  { %11 = vst [vmem:[#allocation2] sm:$0x1] %v10_v0 }
   0x3 LB: > { %s434_s21 = sadd.s32 4294967295, %s512_s20   ;;  %p438_p0 = scmp.ge.s32.totalorder %s512_s20, 1  ;;  %s512_s20 = sphi %s549_s20, %s17_s20  }
   0x4   : > { %p188_p1 = scmp.lt.s32.totalorder %s512_s20, 3 }
   0x6   : > { %p189_p2 = pnand %p438_p0, %p188_p1 }
   0x7   : > { %v494_v1 = vld [vmem:[%s613_s1] sm:$0xff] (!%p189_p2)   ;;  %v514_v2 = vmov (!%p189_p2), 0.0   ;;  %vm288_vm0 = vcmask (!%p189_p2), 261120   ;;  %v495_v4 = vld [vmem:[%s613_s1 + $0x8] sm:$0xff] (!%p189_p2)   ;;  %vm515_vm1 = vmmov (!%p189_p2), 0   ;;  %v496_v6 = vld [vmem:[%s613_s1 + $0x10] sm:$0xff] (!%p189_p2)  }
   0x8   : > { %192 = sbr.rel (%p189_p2) target bundleno = 461 (0x1cd), region = 40  ;;  %464 = vmatprep.subr.bf16.mxu0 (!%p189_p2), %v514_v2  ;;  %v293_v3 = vsel (!%p189_p2), %vm288_vm0, %v494_v1, 0  ;;  %v296_v5 = vsel (!%p189_p2), %vm288_vm0, %v495_v4, 0  ;;  %480 = vmatprep.mubr.msk.bf16.mxu0 (!%p189_p2), %vm515_vm1, %v514_v2  ;;  %v299_v7 = vsel (!%p189_p2), %vm288_vm0, %v496_v6, 0  ;;  %v497_v8 = vld [vmem:[%s613_s1 + $0x18] sm:$0xff] (!%p189_p2)   ;;  %v498_v10 = vld [vmem:[%s613_s1 + $0x20] sm:$0xff] (!%p189_p2)  }
   0x9   : > { %465 = vmatpush3.bf16.xpose.msra.mxu0 (!%p189_p2), %v293_v3  ;;  %v302_v9 = vsel (!%p189_p2), %vm288_vm0, %v497_v8, 0  ;;  %v305_v11 = vsel (!%p189_p2), %vm288_vm0, %v498_v10, 0  ;;  %v499_v12 = vld [vmem:[%s613_s1 + $0x28] sm:$0xff] (!%p189_p2)   ;;  %v500_v14 = vld [vmem:[%s613_s1 + $0x30] sm:$0xff] (!%p189_p2)   ;;  %p214_p3 = scmp.lt.s32.totalorder (!%p189_p2), %s434_s21, 1  ;;  %v501_v16 = vld [vmem:[%s613_s1 + $0x38] sm:$0xff] (!%p189_p2)  }
   0xa   : > { %466 = vmatprep.subr.bf16.mxu0 (!%p189_p2), %v514_v2  ;;  %v308_v13 = vsel (!%p189_p2), %vm288_vm0, %v499_v12, 0  ;;  %v311_v15 = vsel (!%p189_p2), %vm288_vm0, %v500_v14, 0  ;;  %v314_v17 = vsel (!%p189_p2), %vm288_vm0, %v501_v16, 0  ;;  %v441_v20 = vld [vmem:[%s614_s2] ss:$0 sm:$0xff] (!%p189_p2)  ;;  %vm379_vm2 = vcmask (!%p189_p2), 7168  }
   0xb   : > { %v451_v22 = vld [vmem:[%s615_s3] ss:$0 sm:$0xff] (!%p189_p2) }
   0xc   : > { %v452_v28 = vld [vmem:[#allocation2] ss:$0 sm:$0xff] (!%p189_p2) }
   0xf   : > { %s619_s21 = smov (!%p214_p3, %s434_s21), 1 }
  0x10   : > { %s439_s12 = sshll.u32 %s619_s21, 3 }
  0x11   : > { %467 = vmatpush3.bf16.xpose.msra.mxu0 %v296_v5  ;;  %s217_s15 = scalar_lea.vmem %s612_s0, %s439_s12  ;;  %s221_s23 = scalar_lea.vmem %s617_s5, %s439_s12 }
  0x12   : > { %468 = vmatprep.subr.bf16.mxu0 %v514_v2  ;;  %v223_v18 = vld [vmem:[%s217_s15] sm:$0xff] }
  0x13   : > { %v224_v19 = vpack.c.bf16 %v223_v18, %v223_v18 }
  0x19   : > { %469 = vmatpush3.bf16.xpose.msra.mxu0 %v299_v7 }
  0x1a   : > { %470 = vmatprep.subr.bf16.mxu0 %v514_v2 }
  0x21   : > { %471 = vmatpush3.bf16.xpose.msra.mxu0 %v302_v9 }
  0x22   : > { %472 = vmatprep.subr.bf16.mxu0 %v514_v2 }
  0x29   : > { %473 = vmatpush3.bf16.xpose.msra.mxu0 %v305_v11 }
  0x2a   : > { %474 = vmatprep.subr.bf16.mxu0 %v514_v2 }
  0x31   : > { %475 = vmatpush3.bf16.xpose.msra.mxu0 %v308_v13 }
  0x32   : > { %476 = vmatprep.subr.bf16.mxu0 %v514_v2 }
  0x39   : > { %477 = vmatpush3.bf16.xpose.msra.mxu0 %v311_v15 }
  0x3a   : > { %478 = vmatprep.subr.bf16.mxu0 %v514_v2 }
  0x41   : > { %479 = vmatpush3.bf16.xpose.msra.mxu0 %v314_v17 }
  0x48   : > { %481 = vmatmul.mubr.msk.bf16.vlgmr.msra.gmra.mrb[0].mxu0 %vm288_vm0, %v224_v19 }
 0x11b   : > { %v350_v21 = vpop.f32.mrb[0].mxu0 }
 0x11c   : > { %v351_v23 = vadd.f32 %v441_v20, %v350_v21  ;;  %v482_v24 = vpop.f32.mrb[1].mxu0 }
 0x11d   : > { %v353_v25 = vpop.f32.mrb[2].mxu0 }
 0x11e   : > { %v483_v26 = vpop.f32.mrb[3].mxu0  ;;  %v363_v27 = vmul.f32 %v451_v22, %v351_v23 }
 0x120   : > { %364 = vadd.xlane.f32.xlu0 %v363_v27 }
 0x1ad   : > { %v365_v29 = vpop.xlane.xlu0 %364 }
 0x1ae   : > { %v373_v30 = vadd.f32 %v452_v28, %v365_v29 }
 0x1b0   : > { %v374_v31 = vsub.f32 0.0, %v373_v30 }
 0x1b2   : > { %v375_v32 = vmul.f32 1.442695, %v374_v31 }
 0x1b4   : > { %502 = vpow2.f32 %v375_v32 }
 0x1be   : > { %v503_v33 = vpop.eup %502 }
 0x1bf   : > { %v377_v34 = vadd.f32 1.0, %v503_v33 }
 0x1c1   : > { %504 = vrcp.f32 %v377_v34 }
 0x1cb   : > { %v505_v35 = vpop.eup %504 }
 0x1cc   : > { %380 = vst.msk [vmem:[%s221_s23] sm:$0xff] %vm379_vm2, %v505_v35 }
 0x1cd PF: > { %s17_s20 = sadd.s32 1, %s512_s20  }
 0x1ce   : > { %p14_p4 = scmp.ge.s32.totalorder %s17_s20, 4  }
 0x1d0   :  { %16 = sbr.rel (!%p14_p4) target bundleno = 3 (0x3), region = 70 }

</bundles_post_ra>
